<compile_context>
chip_gen: v6e
topology: v6e:2x2x1
jax: 0.10.0
libtpu: 0.0.40
codegen_flags: <defaults>
</compile_context>

<pallas_src>
import functools

import jax
import jax.numpy as jnp
from jax.experimental import pallas as pl
from jax.experimental.pallas import tpu as pltpu


# ----------------------------------------------------------------------------
# tiling helper
# ----------------------------------------------------------------------------
def _pick_pixel_tile(P, C, itemsize, target_bytes=2 * 1024 * 1024):
    """Largest pixel tile TP that is a multiple of 128, divides P, and keeps a
    (C, TP) tile under ~target_bytes. Falls back to the full extent for small
    or non-128-divisible maps (then the grid has a single pixel step)."""
    if P % 128 != 0:
        return P
    cap = max(128, (target_bytes // (C * itemsize)) // 128 * 128)
    tp = min(P, cap)
    while P % tp != 0:
        tp -= 128
    return tp


# ----------------------------------------------------------------------------
# Pallas kernels
# ----------------------------------------------------------------------------
def _gap_cls_kernel(x_ref, w_ref, o_ref, acc_ref, *, inv_p):
    """Streaming GAP + 1x1 conv (no bias).

    x_ref:   (1, C, TP)  feature tile (native dtype), pixels on lanes
    w_ref:   (K, C)      classifier weight (resident)
    o_ref:   (1, K, 1)   logits for this batch element
    acc_ref: (C, 1)      f32 running pixel-sum (VMEM scratch)
    """
    p = pl.program_id(1)

    @pl.when(p == 0)
    def _():
        acc_ref[...] = jnp.zeros_like(acc_ref)

    x = x_ref[0].astype(jnp.float32)                       # (C, TP)  f32 accum
    acc_ref[...] += jnp.sum(x, axis=-1, keepdims=True)     # (C, 1)

    @pl.when(p == pl.num_programs(1) - 1)
    def _():
        pooled = acc_ref[...] * inv_p                      # (C, 1) == adaptive_avg_pool2d((1,1))
        o_ref[0] = jnp.dot(
            w_ref[...].astype(jnp.float32), pooled,        # (K, C) @ (C, 1)
            preferred_element_type=jnp.float32,
        ).astype(o_ref.dtype)                              # (K, 1)


def _cam_kernel(x_ref, w_ref, o_ref):
    """Per-pixel 1x1 conv (no bias) — `cam_only` branch, lane-dense output.

    x_ref: (1, C, TP)   w_ref: (K, C)   o_ref: (1, K, TP)
    """
    o_ref[0] = jnp.dot(
        w_ref[...], x_ref[0],                              # (K, C) @ (C, TP)
        preferred_element_type=jnp.float32,
    ).astype(o_ref.dtype)


# ----------------------------------------------------------------------------
# pallas_call wrappers
# ----------------------------------------------------------------------------
def _gap_cls_call(x_bcp, w_kc):
    """x_bcp: (B, C, P) native dtype; w_kc: (K, C) -> (B, K) float32."""
    B, C, P = x_bcp.shape
    K = w_kc.shape[0]
    TP = _pick_pixel_tile(P, C, jnp.dtype(x_bcp.dtype).itemsize)
    grid = (B, P // TP)
    kernel = functools.partial(_gap_cls_kernel, inv_p=1.0 / float(P))
    out = pl.pallas_call(
        kernel,
        out_shape=jax.ShapeDtypeStruct((B, K, 1), jnp.float32),
        grid_spec=pltpu.PrefetchScalarGridSpec(
            num_scalar_prefetch=0,
            grid=grid,
            in_specs=[
                pl.BlockSpec((1, C, TP), lambda b, p: (b, 0, p)),
                pl.BlockSpec((K, C), lambda b, p: (0, 0)),     # weight resident
            ],
            out_specs=pl.BlockSpec((1, K, 1), lambda b, p: (b, 0, 0)),
            scratch_shapes=[pltpu.VMEM((C, 1), jnp.float32)],
        ),
        compiler_params=pltpu.CompilerParams(
            dimension_semantics=("parallel", "arbitrary")),
    )(x_bcp, w_kc)
    return out.reshape(B, K)


@jax.jit
def _cls_forward(x4_nchw, x3_nchw, w1_kc, w2_kc):
    """Both GAP+classifier launches under one jit dispatch."""
    B4, C4, H4, W4 = x4_nchw.shape
    B3, C3, H3, W3 = x3_nchw.shape
    cls_x4 = _gap_cls_call(x4_nchw.reshape(B4, C4, H4 * W4), w1_kc)
    aux_cls = _gap_cls_call(x3_nchw.reshape(B3, C3, H3 * W3), w2_kc)
    return cls_x4, aux_cls


@jax.jit
def _cam_forward(x4_nchw, w_kc):
    """x4_nchw: (B, C, H, W); w_kc: (K, C) -> cam (B, K, H, W) (NCHW, like PyTorch)."""
    B, C, H, W = x4_nchw.shape
    K = w_kc.shape[0]
    P = H * W
    x = x4_nchw.reshape(B, C, P)
    w = w_kc.astype(x.dtype)                     # tiny cast; MXU consumes native dtype
    TP = _pick_pixel_tile(P, C, jnp.dtype(x.dtype).itemsize)
    grid = (B, P // TP)
    out = pl.pallas_call(
        _cam_kernel,
        out_shape=jax.ShapeDtypeStruct((B, K, P), x.dtype),
        grid_spec=pltpu.PrefetchScalarGridSpec(
            num_scalar_prefetch=0,
            grid=grid,
            in_specs=[
                pl.BlockSpec((1, C, TP), lambda b, p: (b, 0, p)),
                pl.BlockSpec((K, C), lambda b, p: (0, 0)),     # weight resident
            ],
            out_specs=pl.BlockSpec((1, K, TP), lambda b, p: (b, 0, p)),
        ),
        compiler_params=pltpu.CompilerParams(
            dimension_semantics=("parallel", "parallel")),
    )(x, w)
    return out.reshape(B, K, H, W)


# ----------------------------------------------------------------------------
# TSCD module (parameters + forward glue)
# ----------------------------------------------------------------------------
class TSCDPallas:
    def __init__(self, num_classes, in_channels, key):
        self.num_classes = num_classes
        self.in_channels = tuple(in_channels)
        k1, k2 = jax.random.split(key, 2)
        K = num_classes - 1
        c4 = self.in_channels[3]
        c3 = self.in_channels[2]
        # nn.Conv2d(cX, K, 1, bias=False).weight has shape (K, cX, 1, 1);
        # stored squeezed as (K, cX). Deterministic kaiming-ish init.
        std4 = (2.0 / c4) ** 0.5
        std3 = (2.0 / c3) ** 0.5
        self.w_classifier = jax.random.normal(k1, (K, c4), jnp.float32) * std4
        self.w_classifier2 = jax.random.normal(k2, (K, c3), jnp.float32) * std3
        # TODO(synk): SegFormerHead decoder / attn_proj / CAM_Fusion params omitted
        # (decoder & CAM_Fusion definitions are not available; attn_proj unused in forward).

    def forward(self, feats_nchw, cam_only=False):
        """feats_nchw: tuple of 4 NCHW feature maps (_x1, _x2, _x3, _x4)."""
        _x1, _x2, _x3, _x4 = feats_nchw
        if cam_only:
            # cam = F.conv2d(_x4, classifier.weight)  -> NCHW (B, K, H, W)
            return _cam_forward(_x4, self.w_classifier)
        # pooling == 'gap' -> adaptive_avg_pool2d((1,1)), then 1x1 conv, view(-1, K)
        cls_x4, aux_cls = _cls_forward(_x4, _x3, self.w_classifier, self.w_classifier2)
        # TODO(synk): segs = SegFormerHead(feats) not computed (decoder unavailable).
        return cls_x4, aux_cls, feats_nchw


# ----------------------------------------------------------------------------
# main: deterministic small-shape run + correctness check vs plain JAX
# ----------------------------------------------------------------------------
if __name__ == "__main__":
    key = jax.random.PRNGKey(0)
    kx, kf1, kf2, kf3, kf4, kparam = jax.random.split(key, 6)

    B = 2
    num_classes = 11                       # -> 10 classifier outputs
    in_channels = (16, 32, 64, 128)        # encoder.embed_dims (small variant)
    img = jax.random.normal(kx, (B, 3, 64, 64), jnp.float32)  # nominal NCHW input (encoder stubbed)

    # Synthetic multi-scale features at strides (4, 8, 16, 32) of a 64x64 input, NCHW.
    feats = (
        jax.random.normal(kf1, (B, in_channels[0], 16, 16), jnp.float32),
        jax.random.normal(kf2, (B, in_channels[1], 8, 8), jnp.float32),
        jax.random.normal(kf3, (B, in_channels[2], 4, 4), jnp.float32),
        jax.random.normal(kf4, (B, in_channels[3], 2, 2), jnp.float32),
    )

    model = TSCDPallas(num_classes=num_classes, in_channels=in_channels, key=kparam)

    cls_x4, aux_cls, _x = model.forward(feats)
    cam = model.forward(feats, cam_only=True)
    jax.block_until_ready((cls_x4, aux_cls, cam))

    # correctness check against plain-JAX reference
    ref_cls = jnp.mean(feats[3].astype(jnp.float32), axis=(2, 3)) @ model.w_classifier.T
    ref_aux = jnp.mean(feats[2].astype(jnp.float32), axis=(2, 3)) @ model.w_classifier2.T
    ref_cam = jnp.einsum("bchw,kc->bkhw", feats[3], model.w_classifier)

    assert cls_x4.shape == (B, num_classes - 1)
    assert aux_cls.shape == (B, num_classes - 1)
    assert cam.shape == (B, num_classes - 1, 2, 2)
    assert jnp.allclose(cls_x4, ref_cls, atol=1e-4, rtol=1e-4)
    assert jnp.allclose(aux_cls, ref_aux, atol=1e-4, rtol=1e-4)
    assert jnp.allclose(cam, ref_cam, atol=1e-4, rtol=1e-4)

    print("KERNEL_OK")
</pallas_src>

<mosaic_0001>
module attributes {stable_mosaic.version = 11 : i64} {
  func.func @_gap_cls_kernel(%arg0: i32, %arg1: i32, %arg2: memref<1x128x4xf32, #tpu.memory_space<vmem>>, %arg3: memref<10x128xf32, #tpu.memory_space<vmem>>, %arg4: memref<1x10x1xf32, #tpu.memory_space<vmem>>, %arg5: memref<128x1xf32, #tpu.memory_space<vmem>>) attributes {dimension_semantics = [#tpu.dimension_semantics<parallel>, #tpu.dimension_semantics<arbitrary>], iteration_bounds = array<i64: 2, 1>, scalar_prefetch = 0 : i64, scratch_operands = 1 : i64, tpu.core_type = #tpu.core_type<tc>, window_params = [{transform_indices = @transform_0, window_bounds = array<i64: 1, 128, 4>}, {pipeline_mode = #tpu.pipeline_mode<synchronous>, transform_indices = @transform_1, window_bounds = array<i64: 10, 128>}, {transform_indices = @transform_2, window_bounds = array<i64: 1, 10, 1>}]} {
    %c0_i32 = arith.constant 0 : i32
    %0 = arith.cmpi eq, %arg1, %c0_i32 : i32
    %1 = arith.extui %0 : i1 to i32
    %c0_i32_0 = arith.constant 0 : i32
    %2 = arith.cmpi ne, %1, %c0_i32_0 : i32
    scf.if %2 {
      %cst_9 = arith.constant 0.000000e+00 : f32
      %13 = vector.broadcast %cst_9 : f32 to vector<128x1xf32>
      %c0_10 = arith.constant 0 : index
      %c0_11 = arith.constant 0 : index
      %14 = vector.load %arg5[%c0_10, %c0_11] : memref<128x1xf32, #tpu.memory_space<vmem>>, vector<128x1xf32>
      tpu.vector_store %arg5[%c0_10, %c0_11], %13 {strides = array<i32>} : memref<128x1xf32, #tpu.memory_space<vmem>>, vector<128x1xf32>,
    } else {
    }
    %c0 = arith.constant 0 : index
    %c0_1 = arith.constant 0 : index
    %c0_2 = arith.constant 0 : index
    %3 = vector.load %arg2[%c0, %c0_1, %c0_2] : memref<1x128x4xf32, #tpu.memory_space<vmem>>, vector<1x128x4xf32>
    %4 = vector.shape_cast %3 : vector<1x128x4xf32> to vector<128x4xf32>
    %c0_3 = arith.constant 0 : index
    %c0_4 = arith.constant 0 : index
    %5 = vector.load %arg5[%c0_3, %c0_4] : memref<128x1xf32, #tpu.memory_space<vmem>>, vector<128x1xf32>
    %cst = arith.constant dense<0.000000e+00> : vector<128xf32>
    %6 = vector.multi_reduction <add>, %4, %cst [1] : vector<128x4xf32> to vector<128xf32>
    %7 = vector.shape_cast %6 : vector<128xf32> to vector<128x1xf32>
    %8 = arith.addf %5, %7 : vector<128x1xf32>
    %c0_5 = arith.constant 0 : index
    %c0_6 = arith.constant 0 : index
    %9 = vector.load %arg5[%c0_5, %c0_6] : memref<128x1xf32, #tpu.memory_space<vmem>>, vector<128x1xf32>
    tpu.vector_store %arg5[%c0_5, %c0_6], %8 {strides = array<i32>} : memref<128x1xf32, #tpu.memory_space<vmem>>, vector<128x1xf32>,
    %c0_i32_7 = arith.constant 0 : i32
    %10 = arith.cmpi eq, %arg1, %c0_i32_7 : i32
    %11 = arith.extui %10 : i1 to i32
    %c0_i32_8 = arith.constant 0 : i32
    %12 = arith.cmpi ne, %11, %c0_i32_8 : i32
    scf.if %12 {
      %c0_9 = arith.constant 0 : index
      %c0_10 = arith.constant 0 : index
      %13 = vector.load %arg5[%c0_9, %c0_10] : memref<128x1xf32, #tpu.memory_space<vmem>>, vector<128x1xf32>
      %cst_11 = arith.constant 2.500000e-01 : f32
      %14 = vector.broadcast %cst_11 : f32 to vector<128x1xf32>
      %15 = arith.mulf %13, %14 : vector<128x1xf32>
      %c0_12 = arith.constant 0 : index
      %c0_13 = arith.constant 0 : index
      %16 = vector.load %arg3[%c0_12, %c0_13] : memref<10x128xf32, #tpu.memory_space<vmem>>, vector<10x128xf32>
      %cst_14 = arith.constant dense<0.000000e+00> : vector<10x1xf32>
      %17 = tpu.matmul %16, %15, %cst_14 {dimension_numbers = #tpu.dot_dimension_numbers<[1], [0], [0], [1], [0, 0, 1, 1], [], []>} : vector<10x128xf32>, vector<128x1xf32>, vector<10x1xf32> -> vector<10x1xf32>
      %c0_15 = arith.constant 0 : index
      %c0_16 = arith.constant 0 : index
      %c0_17 = arith.constant 0 : index
      %18 = vector.load %arg4[%c0_15, %c0_16, %c0_17] : memref<1x10x1xf32, #tpu.memory_space<vmem>>, vector<1x10x1xf32>
      %19 = vector.shape_cast %18 : vector<1x10x1xf32> to vector<10x1xf32>
      %20 = vector.shape_cast %17 : vector<10x1xf32> to vector<1x10x1xf32>
      tpu.vector_store %arg4[%c0_15, %c0_16, %c0_17], %20 {strides = array<i32>} : memref<1x10x1xf32, #tpu.memory_space<vmem>>, vector<1x10x1xf32>,
    } else {
    }
    return
  }
  func.func @transform_0(%arg0: i32, %arg1: i32) -> (i32, i32, i32) {
    %c0_i32 = arith.constant 0 : i32
    %c0_i32_0 = arith.constant 0 : i32
    return %arg0, %c0_i32, %arg1 : i32, i32, i32
  }
  func.func @transform_1(%arg0: i32, %arg1: i32) -> (i32, i32) {
    %c0_i32 = arith.constant 0 : i32
    %c0_i32_0 = arith.constant 0 : i32
    %c0_i32_1 = arith.constant 0 : i32
    return %c0_i32, %c0_i32_0 : i32, i32
  }
  func.func @transform_2(%arg0: i32, %arg1: i32) -> (i32, i32, i32) {
    %c0_i32 = arith.constant 0 : i32
    %c0_i32_0 = arith.constant 0 : i32
    %c0_i32_1 = arith.constant 0 : i32
    return %arg0, %c0_i32, %c0_i32_0 : i32, i32, i32
  }
}

module attributes {stable_mosaic.version = 11 : i64} {
  func.func @_gap_cls_kernel(%arg0: i32, %arg1: i32, %arg2: memref<1x64x16xf32, #tpu.memory_space<vmem>>, %arg3: memref<10x64xf32, #tpu.memory_space<vmem>>, %arg4: memref<1x10x1xf32, #tpu.memory_space<vmem>>, %arg5: memref<64x1xf32, #tpu.memory_space<vmem>>) attributes {dimension_semantics = [#tpu.dimension_semantics<parallel>, #tpu.dimension_semantics<arbitrary>], iteration_bounds = array<i64: 2, 1>, scalar_prefetch = 0 : i64, scratch_operands = 1 : i64, tpu.core_type = #tpu.core_type<tc>, window_params = [{transform_indices = @transform_0, window_bounds = array<i64: 1, 64, 16>}, {pipeline_mode = #tpu.pipeline_mode<synchronous>, transform_indices = @transform_1, window_bounds = array<i64: 10, 64>}, {transform_indices = @transform_2, window_bounds = array<i64: 1, 10, 1>}]} {
    %c0_i32 = arith.constant 0 : i32
    %0 = arith.cmpi eq, %arg1, %c0_i32 : i32
    %1 = arith.extui %0 : i1 to i32
    %c0_i32_0 = arith.constant 0 : i32
    %2 = arith.cmpi ne, %1, %c0_i32_0 : i32
    scf.if %2 {
      %cst_9 = arith.constant 0.000000e+00 : f32
      %13 = vector.broadcast %cst_9 : f32 to vector<64x1xf32>
      %c0_10 = arith.constant 0 : index
      %c0_11 = arith.constant 0 : index
      %14 = vector.load %arg5[%c0_10, %c0_11] : memref<64x1xf32, #tpu.memory_space<vmem>>, vector<64x1xf32>
      tpu.vector_store %arg5[%c0_10, %c0_11], %13 {strides = array<i32>} : memref<64x1xf32, #tpu.memory_space<vmem>>, vector<64x1xf32>,
    } else {
    }
    %c0 = arith.constant 0 : index
    %c0_1 = arith.constant 0 : index
    %c0_2 = arith.constant 0 : index
    %3 = vector.load %arg2[%c0, %c0_1, %c0_2] : memref<1x64x16xf32, #tpu.memory_space<vmem>>, vector<1x64x16xf32>
    %4 = vector.shape_cast %3 : vector<1x64x16xf32> to vector<64x16xf32>
    %c0_3 = arith.constant 0 : index
    %c0_4 = arith.constant 0 : index
    %5 = vector.load %arg5[%c0_3, %c0_4] : memref<64x1xf32, #tpu.memory_space<vmem>>, vector<64x1xf32>
    %cst = arith.constant dense<0.000000e+00> : vector<64xf32>
    %6 = vector.multi_reduction <add>, %4, %cst [1] : vector<64x16xf32> to vector<64xf32>
    %7 = vector.shape_cast %6 : vector<64xf32> to vector<64x1xf32>
    %8 = arith.addf %5, %7 : vector<64x1xf32>
    %c0_5 = arith.constant 0 : index
    %c0_6 = arith.constant 0 : index
    %9 = vector.load %arg5[%c0_5, %c0_6] : memref<64x1xf32, #tpu.memory_space<vmem>>, vector<64x1xf32>
    tpu.vector_store %arg5[%c0_5, %c0_6], %8 {strides = array<i32>} : memref<64x1xf32, #tpu.memory_space<vmem>>, vector<64x1xf32>,
    %c0_i32_7 = arith.constant 0 : i32
    %10 = arith.cmpi eq, %arg1, %c0_i32_7 : i32
    %11 = arith.extui %10 : i1 to i32
    %c0_i32_8 = arith.constant 0 : i32
    %12 = arith.cmpi ne, %11, %c0_i32_8 : i32
    scf.if %12 {
      %c0_9 = arith.constant 0 : index
      %c0_10 = arith.constant 0 : index
      %13 = vector.load %arg5[%c0_9, %c0_10] : memref<64x1xf32, #tpu.memory_space<vmem>>, vector<64x1xf32>
      %cst_11 = arith.constant 6.250000e-02 : f32
      %14 = vector.broadcast %cst_11 : f32 to vector<64x1xf32>
      %15 = arith.mulf %13, %14 : vector<64x1xf32>
      %c0_12 = arith.constant 0 : index
      %c0_13 = arith.constant 0 : index
      %16 = vector.load %arg3[%c0_12, %c0_13] : memref<10x64xf32, #tpu.memory_space<vmem>>, vector<10x64xf32>
      %cst_14 = arith.constant dense<0.000000e+00> : vector<10x1xf32>
      %17 = tpu.matmul %16, %15, %cst_14 {dimension_numbers = #tpu.dot_dimension_numbers<[1], [0], [0], [1], [0, 0, 1, 1], [], []>} : vector<10x64xf32>, vector<64x1xf32>, vector<10x1xf32> -> vector<10x1xf32>
      %c0_15 = arith.constant 0 : index
      %c0_16 = arith.constant 0 : index
      %c0_17 = arith.constant 0 : index
      %18 = vector.load %arg4[%c0_15, %c0_16, %c0_17] : memref<1x10x1xf32, #tpu.memory_space<vmem>>, vector<1x10x1xf32>
      %19 = vector.shape_cast %18 : vector<1x10x1xf32> to vector<10x1xf32>
      %20 = vector.shape_cast %17 : vector<10x1xf32> to vector<1x10x1xf32>
      tpu.vector_store %arg4[%c0_15, %c0_16, %c0_17], %20 {strides = array<i32>} : memref<1x10x1xf32, #tpu.memory_space<vmem>>, vector<1x10x1xf32>,
    } else {
    }
    return
  }
  func.func @transform_0(%arg0: i32, %arg1: i32) -> (i32, i32, i32) {
    %c0_i32 = arith.constant 0 : i32
    %c0_i32_0 = arith.constant 0 : i32
    return %arg0, %c0_i32, %arg1 : i32, i32, i32
  }
  func.func @transform_1(%arg0: i32, %arg1: i32) -> (i32, i32) {
    %c0_i32 = arith.constant 0 : i32
    %c0_i32_0 = arith.constant 0 : i32
    %c0_i32_1 = arith.constant 0 : i32
    return %c0_i32, %c0_i32_0 : i32, i32
  }
  func.func @transform_2(%arg0: i32, %arg1: i32) -> (i32, i32, i32) {
    %c0_i32 = arith.constant 0 : i32
    %c0_i32_0 = arith.constant 0 : i32
    %c0_i32_1 = arith.constant 0 : i32
    return %arg0, %c0_i32, %c0_i32_0 : i32, i32, i32
  }
}

</mosaic_0001>

<bundles_post_ra>
// kernel: _cls_forward.2
= control target key start
LH: loop header
LB: loop body
LE: loop exit
PB: predicated region body
PF: predicated region fallthrough
CT: control target
= control target key end

     0   :  { %s617_s9 = smov 0   ;;  %s619_s10 = smov 0   ;;  %s728_s0 = inlined_call_operand.vmem [shape: f32[2,128,4], index: 0, kind: input, shape index: {}]   ;;  %s729_s1 = inlined_call_operand.vmem [shape: f32[10,128], index: 1, kind: input, shape index: {}]   ;;  %s730_s2 = inlined_call_operand.vmem [shape: f32[2,10,1], index: 2, kind: output, shape index: {}]  }
   0x1   :  { %s621_s11 = smov 0  }
   0x2 LB: > { %s24_s12 = sadd.s32 1, %s595_s10  ;;  %p490_p0 = scmp.ge.s32.totalorder %s599_s11, 1  ;;  %s599_s11 = sphi %s621_s11, %s12_s11   ;;  %s595_s10 = sphi %s619_s10, %s732_s10   ;;  %s591_s9 = sphi %s617_s9, %s731_s9  }
   0x3   : > { %p26_p1 = scmp.ge.s32.totalorder %s24_s12, 2  ;;  %p129_p2 = scmp.lt.s32.totalorder %s599_s11, 3 }
   0x5   : > { %s734_s12 = smov (%p26_p1, %s24_s12), 0  ;;  %p130_p3 = pnand %p490_p0, %p129_p2 }
   0x6   : > { %p154_p4 = scmp.lt.s32.totalorder (!%p130_p3), %s591_s9, 1 }
   0x7   : > { %133 = sbr.rel (%p130_p3) target bundleno = 397 (0x18d), region = 28 }
   0xc   : > { %vm171_vm0 = vcmask 7168   ;;  %v601_v0 = vmov 0.0   ;;  %s736_s9 = smov (!%p154_p4, %s591_s9), 1  ;;  %vm220_vm1 = vcmask 31744   ;;  %v337_v33 = vld [vmem:[%s729_s1] sm:$0xff]  ;;  %vm415_vm2 = vcmask 1024  }
   0xd   : > { %187 = vst.msk [vmem:[#allocation2 + $0x78] sm:$0xff] %vm171_vm0, %v601_v0  ;;  %172 = vst.msk [vmem:[#allocation2] sm:$0xff] %vm171_vm0, %v601_v0  ;;  %s497_s13 = sshll.u32 %s736_s9, 7  ;;  %549 = vmatprep.mubr.f32.mxu0 %v337_v33  ;;  %s498_s21 = sshll.u32 %s736_s9, 4 }
   0xe   : > { %173 = vst.msk [vmem:[#allocation2 + $0x8] sm:$0xff] %vm171_vm0, %v601_v0  ;;  %174 = vst.msk [vmem:[#allocation2 + $0x10] sm:$0xff] %vm171_vm0, %v601_v0  ;;  %s658_s16 = scalar_lea.vmem %s728_s0, %s497_s13  ;;  %s166_s24 = scalar_lea.vmem %s730_s2, %s498_s21 }
   0xf   : > { %175 = vst.msk [vmem:[#allocation2 + $0x18] sm:$0xff] %vm171_vm0, %v601_v0  ;;  %176 = vst.msk [vmem:[#allocation2 + $0x20] sm:$0xff] %vm171_vm0, %v601_v0  ;;  %v203_v1 = vld [vmem:[%s658_s16 + $0x78] sm:$0xff]  ;;  %v202_v2 = vld [vmem:[%s658_s16 + $0x70] sm:$0xff] }
  0x10   : > { %177 = vst.msk [vmem:[#allocation2 + $0x28] sm:$0xff] %vm171_vm0, %v601_v0  ;;  %178 = vst.msk [vmem:[#allocation2 + $0x30] sm:$0xff] %vm171_vm0, %v601_v0  ;;  %v201_v3 = vld [vmem:[%s658_s16 + $0x68] sm:$0xff]  ;;  %v266_v4 = vsel %vm220_vm1, %v203_v1, 0.0  ;;  %v200_v6 = vld [vmem:[%s658_s16 + $0x60] sm:$0xff]  ;;  %v263_v7 = vsel %vm220_vm1, %v202_v2, 0.0 }
  0x11   : > { %179 = vst.msk [vmem:[#allocation2 + $0x38] sm:$0xff] %vm171_vm0, %v601_v0  ;;  %180 = vst.msk [vmem:[#allocation2 + $0x40] sm:$0xff] %vm171_vm0, %v601_v0  ;;  %v260_v5 = vsel %vm220_vm1, %v201_v3, 0.0  ;;  %267 = vadd.xlane.f32.xlu0 %v266_v4  ;;  %v257_v8 = vsel %vm220_vm1, %v200_v6, 0.0  ;;  %v199_v9 = vld [vmem:[%s658_s16 + $0x58] sm:$0xff]  ;;  %v198_v10 = vld [vmem:[%s658_s16 + $0x50] sm:$0xff] }
  0x12   : > { %181 = vst.msk [vmem:[#allocation2 + $0x48] sm:$0xff] %vm171_vm0, %v601_v0  ;;  %182 = vst.msk [vmem:[#allocation2 + $0x50] sm:$0xff] %vm171_vm0, %v601_v0  ;;  %261 = vadd.xlane.f32.xlu1 %v260_v5  ;;  %v254_v11 = vsel %vm220_vm1, %v199_v9, 0.0  ;;  %v251_v12 = vsel %vm220_vm1, %v198_v10, 0.0  ;;  %v197_v13 = vld [vmem:[%s658_s16 + $0x48] sm:$0xff]  ;;  %v196_v14 = vld [vmem:[%s658_s16 + $0x40] sm:$0xff] }
  0x13   : > { %183 = vst.msk [vmem:[#allocation2 + $0x58] sm:$0xff] %vm171_vm0, %v601_v0  ;;  %184 = vst.msk [vmem:[#allocation2 + $0x60] sm:$0xff] %vm171_vm0, %v601_v0  ;;  %v248_v15 = vsel %vm220_vm1, %v197_v13, 0.0  ;;  %v245_v16 = vsel %vm220_vm1, %v196_v14, 0.0  ;;  %v195_v17 = vld [vmem:[%s658_s16 + $0x38] sm:$0xff]  ;;  %v194_v18 = vld [vmem:[%s658_s16 + $0x30] sm:$0xff] }
  0x14   : > { %185 = vst.msk [vmem:[#allocation2 + $0x68] sm:$0xff] %vm171_vm0, %v601_v0  ;;  %186 = vst.msk [vmem:[#allocation2 + $0x70] sm:$0xff] %vm171_vm0, %v601_v0  ;;  %v242_v19 = vsel %vm220_vm1, %v195_v17, 0.0  ;;  %v239_v20 = vsel %vm220_vm1, %v194_v18, 0.0  ;;  %v193_v21 = vld [vmem:[%s658_s16 + $0x28] sm:$0xff]  ;;  %v192_v22 = vld [vmem:[%s658_s16 + $0x20] sm:$0xff] }
  0x15   : > { %264 = vadd.xlane.f32.xlu0 %v263_v7  ;;  %v236_v23 = vsel %vm220_vm1, %v193_v21, 0.0  ;;  %v233_v24 = vsel %vm220_vm1, %v192_v22, 0.0  ;;  %v191_v25 = vld [vmem:[%s658_s16 + $0x18] sm:$0xff]  ;;  %v190_v26 = vld [vmem:[%s658_s16 + $0x10] sm:$0xff]  ;;  %v189_v29 = vld [vmem:[%s658_s16 + $0x8] sm:$0xff] }
  0x16   : > { %258 = vadd.xlane.f32.xlu1 %v257_v8  ;;  %v230_v27 = vsel %vm220_vm1, %v191_v25, 0.0  ;;  %v227_v28 = vsel %vm220_vm1, %v190_v26, 0.0  ;;  %v188_v30 = vld [vmem:[%s658_s16] sm:$0xff]  ;;  %v224_v31 = vsel %vm220_vm1, %v189_v29, 0.0  ;;  %v219_v34 = vld [vmem:[#allocation2 + $0x78] sm:$0xff] }
  0x17   : > { %v221_v32 = vsel %vm220_vm1, %v188_v30, 0.0  ;;  %v210_v61 = vld [vmem:[#allocation2 + $0x30] sm:$0xff]  ;;  %v209_v8 = vld [vmem:[#allocation2 + $0x28] sm:$0xff]  ;;  %v208_v10 = vld [vmem:[#allocation2 + $0x20] sm:$0xff] }
  0x18   : > { %v212_v54 = vld [vmem:[#allocation2 + $0x40] sm:$0xff]  ;;  %v211_v60 = vld [vmem:[#allocation2 + $0x38] sm:$0xff] }
  0x19   : > { %255 = vadd.xlane.f32.xlu0 %v254_v11  ;;  %v214_v47 = vld [vmem:[#allocation2 + $0x50] sm:$0xff]  ;;  %v213_v53 = vld [vmem:[#allocation2 + $0x48] sm:$0xff]  ;;  %v207_v18 = vld [vmem:[#allocation2 + $0x18] sm:$0xff] }
  0x1a   : > { %252 = vadd.xlane.f32.xlu1 %v251_v12  ;;  %v216_v41 = vld [vmem:[#allocation2 + $0x60] sm:$0xff]  ;;  %v215_v46 = vld [vmem:[#allocation2 + $0x58] sm:$0xff] }
  0x1b   : > { %v217_v35 = vld [vmem:[#allocation2 + $0x68] sm:$0xff]  ;;  %v218_v40 = vld [vmem:[#allocation2 + $0x70] sm:$0xff]  ;;  %v204_v30 = vld [vmem:[#allocation2] sm:$0xff] }
  0x1d   : > { %249 = vadd.xlane.f32.xlu0 %v248_v15 }
  0x1e   : > { %246 = vadd.xlane.f32.xlu1 %v245_v16 }
  0x21   : > { %243 = vadd.xlane.f32.xlu0 %v242_v19 }
  0x22   : > { %240 = vadd.xlane.f32.xlu1 %v239_v20  ;;  %v206_v20 = vld [vmem:[#allocation2 + $0x10] sm:$0xff] }
  0x25   : > { %237 = vadd.xlane.f32.xlu0 %v236_v23 }
  0x26   : > { %234 = vadd.xlane.f32.xlu1 %v233_v24 }
  0x29   : > { %231 = vadd.xlane.f32.xlu0 %v230_v27 }
  0x2a   : > { %228 = vadd.xlane.f32.xlu1 %v227_v28  ;;  %v205_v28 = vld [vmem:[#allocation2 + $0x8] sm:$0xff] }
  0x2d   : > { %225 = vadd.xlane.f32.xlu0 %v224_v31 }
  0x2e   : > { %222 = vadd.xlane.f32.xlu1 %v221_v32 }
  0x9a   : > { %v268_v36 = vpop.xlane.xlu0 %267 }
  0x9b   : > { %v262_v37 = vpop.xlane.xlu1 %261  ;;  %v284_v38 = vadd.f32 %v268_v36, %v219_v34 }
  0x9c   : > { %v282_v39 = vadd.f32 %v262_v37, %v217_v35 }
  0x9d   : > { %301 = vst.msk [vmem:[#allocation2 + $0x78] sm:$0xff] %vm171_vm0, %v284_v38 }
  0x9e   : > { %299 = vst.msk [vmem:[#allocation2 + $0x68] sm:$0xff] %vm171_vm0, %v282_v39  ;;  %v265_v42 = vpop.xlane.xlu0 %264 }
  0x9f   : > { %v259_v43 = vpop.xlane.xlu1 %258  ;;  %v283_v44 = vadd.f32 %v265_v42, %v218_v40 }
  0xa0   : > { %v281_v45 = vadd.f32 %v259_v43, %v216_v41 }
  0xa1   : > { %300 = vst.msk [vmem:[#allocation2 + $0x70] sm:$0xff] %vm171_vm0, %v283_v44 }
  0xa2   : > { %298 = vst.msk [vmem:[#allocation2 + $0x60] sm:$0xff] %vm171_vm0, %v281_v45  ;;  %v256_v48 = vpop.xlane.xlu0 %255 }
  0xa3   : > { %v253_v49 = vpop.xlane.xlu1 %252  ;;  %v280_v50 = vadd.f32 %v256_v48, %v215_v46 }
  0xa4   : > { %v279_v51 = vadd.f32 %v253_v49, %v214_v47  ;;  %v320_v52 = vld [vmem:[#allocation2 + $0x78] sm:$0xff] }
  0xa5   : > { %297 = vst.msk [vmem:[#allocation2 + $0x58] sm:$0xff] %vm171_vm0, %v280_v50  ;;  %v336_v55 = vmul.f32 0.25, %v320_v52  ;;  %v318_v63 = vld [vmem:[#allocation2 + $0x68] sm:$0xff] }
  0xa6   : > { %296 = vst.msk [vmem:[#allocation2 + $0x50] sm:$0xff] %vm171_vm0, %v279_v51  ;;  %v250_v56 = vpop.xlane.xlu0 %249  ;;  %v334_v5 = vmul.f32 0.25, %v318_v63  ;;  %v338_v50 = vld [vmem:[%s729_s1 + $0x8] sm:$0x3] }
  0xa7   : > { %v247_v57 = vpop.xlane.xlu1 %246  ;;  %517 = vmatprep.subr.mxu0 %v336_v55  ;;  %v278_v58 = vadd.f32 %v250_v56, %v213_v53 }
  0xa8   : > { %v277_v59 = vadd.f32 %v247_v57, %v212_v54  ;;  %518 = vmatpush3.msra.mxu0 %v336_v55  ;;  %v319_v62 = vld [vmem:[#allocation2 + $0x70] sm:$0xff] }
  0xa9   : > { %v317_v0 = vld [vmem:[#allocation2 + $0x60] sm:$0xff]  ;;  %295 = vst.msk [vmem:[#allocation2 + $0x48] sm:$0xff] %vm171_vm0, %v278_v58  ;;  %v335_v1 = vmul.f32 0.25, %v319_v62 }
  0xaa   : > { %294 = vst.msk [vmem:[#allocation2 + $0x40] sm:$0xff] %vm171_vm0, %v277_v59  ;;  %v244_v2 = vpop.xlane.xlu0 %243  ;;  %v333_v7 = vmul.f32 0.25, %v317_v0 }
  0xab   : > { %v241_v3 = vpop.xlane.xlu1 %240  ;;  %519 = vmatprep.subr.mxu0 %v335_v1  ;;  %v276_v4 = vadd.f32 %v244_v2, %v211_v60 }
  0xac   : > { %v275_v6 = vadd.f32 %v241_v3, %v210_v61  ;;  %520 = vmatpush3.msra.mxu0 %v335_v1  ;;  %v316_v9 = vld [vmem:[#allocation2 + $0x58] sm:$0xff] }
  0xad   : > { %v315_v11 = vld [vmem:[#allocation2 + $0x50] sm:$0xff]  ;;  %293 = vst.msk [vmem:[#allocation2 + $0x38] sm:$0xff] %vm171_vm0, %v276_v4  ;;  %521 = vmatprep.subr.mxu0 %v334_v5  ;;  %v332_v12 = vmul.f32 0.25, %v316_v9 }
  0xae   : > { %292 = vst.msk [vmem:[#allocation2 + $0x30] sm:$0xff] %vm171_vm0, %v275_v6  ;;  %522 = vmatpush3.msra.mxu0 %v334_v5  ;;  %v238_v13 = vpop.xlane.xlu0 %237  ;;  %v331_v17 = vmul.f32 0.25, %v315_v11 }
  0xaf   : > { %v235_v14 = vpop.xlane.xlu1 %234  ;;  %523 = vmatprep.subr.mxu0 %v333_v7  ;;  %v274_v15 = vadd.f32 %v238_v13, %v209_v8 }
  0xb0   : > { %v273_v16 = vadd.f32 %v235_v14, %v208_v10  ;;  %524 = vmatpush3.msra.mxu0 %v333_v7  ;;  %v314_v19 = vld [vmem:[#allocation2 + $0x48] sm:$0xff] }
  0xb1   : > { %v313_v21 = vld [vmem:[#allocation2 + $0x40] sm:$0xff]  ;;  %291 = vst.msk [vmem:[#allocation2 + $0x28] sm:$0xff] %vm171_vm0, %v274_v15  ;;  %525 = vmatprep.subr.mxu0 %v332_v12  ;;  %v330_v22 = vmul.f32 0.25, %v314_v19 }
  0xb2   : > { %290 = vst.msk [vmem:[#allocation2 + $0x20] sm:$0xff] %vm171_vm0, %v273_v16  ;;  %526 = vmatpush3.msra.mxu0 %v332_v12  ;;  %v232_v23 = vpop.xlane.xlu0 %231  ;;  %v329_v27 = vmul.f32 0.25, %v313_v21 }
  0xb3   : > { %v229_v24 = vpop.xlane.xlu1 %228  ;;  %527 = vmatprep.subr.mxu0 %v331_v17  ;;  %v272_v25 = vadd.f32 %v232_v23, %v207_v18 }
  0xb4   : > { %v271_v26 = vadd.f32 %v229_v24, %v206_v20  ;;  %528 = vmatpush3.msra.mxu0 %v331_v17  ;;  %v312_v29 = vld [vmem:[#allocation2 + $0x38] sm:$0xff] }
  0xb5   : > { %v311_v31 = vld [vmem:[#allocation2 + $0x30] sm:$0xff]  ;;  %289 = vst.msk [vmem:[#allocation2 + $0x18] sm:$0xff] %vm171_vm0, %v272_v25  ;;  %529 = vmatprep.subr.mxu0 %v330_v22  ;;  %v328_v32 = vmul.f32 0.25, %v312_v29 }
  0xb6   : > { %288 = vst.msk [vmem:[#allocation2 + $0x10] sm:$0xff] %vm171_vm0, %v271_v26  ;;  %530 = vmatpush3.msra.mxu0 %v330_v22  ;;  %v226_v33 = vpop.xlane.xlu0 %225  ;;  %v327_v37 = vmul.f32 0.25, %v311_v31 }
  0xb7   : > { %v223_v34 = vpop.xlane.xlu1 %222  ;;  %531 = vmatprep.subr.mxu0 %v329_v27  ;;  %v270_v35 = vadd.f32 %v226_v33, %v205_v28 }
  0xb8   : > { %v269_v36 = vadd.f32 %v223_v34, %v204_v30  ;;  %532 = vmatpush3.msra.mxu0 %v329_v27  ;;  %v310_v38 = vld [vmem:[#allocation2 + $0x28] sm:$0xff] }
  0xb9   : > { %v309_v39 = vld [vmem:[#allocation2 + $0x20] sm:$0xff]  ;;  %287 = vst.msk [vmem:[#allocation2 + $0x8] sm:$0xff] %vm171_vm0, %v270_v35  ;;  %533 = vmatprep.subr.mxu0 %v328_v32  ;;  %v326_v40 = vmul.f32 0.25, %v310_v38 }
  0xba   : > { %286 = vst.msk [vmem:[#allocation2] sm:$0xff] %vm171_vm0, %v269_v36  ;;  %534 = vmatpush3.msra.mxu0 %v328_v32  ;;  %v325_v41 = vmul.f32 0.25, %v309_v39 }
  0xbb   : > { %535 = vmatprep.subr.mxu0 %v327_v37 }
  0xbc   : > { %536 = vmatpush3.msra.mxu0 %v327_v37  ;;  %v308_v42 = vld [vmem:[#allocation2 + $0x18] sm:$0xff] }
  0xbd   : > { %v307_v43 = vld [vmem:[#allocation2 + $0x10] sm:$0xff]  ;;  %537 = vmatprep.subr.mxu0 %v326_v40  ;;  %v324_v44 = vmul.f32 0.25, %v308_v42 }
  0xbe   : > { %538 = vmatpush3.msra.mxu0 %v326_v40  ;;  %v323_v45 = vmul.f32 0.25, %v307_v43 }
  0xbf   : > { %539 = vmatprep.subr.mxu0 %v325_v41 }
  0xc0   : > { %540 = vmatpush3.msra.mxu0 %v325_v41  ;;  %v306_v46 = vld [vmem:[#allocation2 + $0x8] sm:$0xff] }
  0xc1   : > { %v305_v47 = vld [vmem:[#allocation2] sm:$0xff]  ;;  %541 = vmatprep.subr.mxu0 %v324_v44  ;;  %v322_v48 = vmul.f32 0.25, %v306_v46 }
  0xc2   : > { %542 = vmatpush3.msra.mxu0 %v324_v44  ;;  %v321_v49 = vmul.f32 0.25, %v305_v47 }
  0xc3   : > { %543 = vmatprep.subr.mxu0 %v323_v45 }
  0xc4   : > { %544 = vmatpush3.msra.mxu0 %v323_v45 }
  0xc5   : > { %545 = vmatprep.subr.mxu0 %v322_v48 }
  0xc6   : > { %546 = vmatpush3.msra.mxu0 %v322_v48 }
  0xc7   : > { %547 = vmatprep.subr.mxu0 %v321_v49 }
  0xc8   : > { %548 = vmatpush3.msra.mxu0 %v321_v49 }
  0xc9   : > { %550 = vmatmul.mubr.f32.vlgmr.msra.gmra.mxu0 %v338_v50 }
 0x189   : > { %v551_v51 = vpop.f32.mrf.mxu0 }
 0x18a   : > { %416 = vst.msk [vmem:[%s166_s24 + $0x8] sm:$0x3] %vm415_vm2, %v551_v51 }
 0x18b   : > { %v405_v52 = vpop.f32.mrf.mxu0 }
 0x18c   : > { %414 = vst.msk [vmem:[%s166_s24] sm:$0xff] %vm171_vm0, %v405_v52 }
 0x18d PF: > { %s12_s11 = sadd.s32 1, %s599_s11   ;;  %s731_s9 = smov %s595_s10 }
 0x18e   : > { %p9_p5 = scmp.ge.s32.totalorder %s12_s11, 4   ;;  %s732_s10 = smov %s734_s12 }
 0x190   :  { %11 = sbr.rel (!%p9_p5) target bundleno = 2 (0x2), region = 66 }

// kernel: _cls_forward.3
= control target key start
LH: loop header
LB: loop body
LE: loop exit
PB: predicated region body
PF: predicated region fallthrough
CT: control target
= control target key end

     0   :  { %s522_s9 = smov 0   ;;  %s524_s10 = smov 0   ;;  %s592_s0 = inlined_call_operand.vmem [shape: f32[2,64,16], index: 0, kind: input, shape index: {}]   ;;  %s593_s1 = inlined_call_operand.vmem [shape: f32[10,64], index: 1, kind: input, shape index: {}]   ;;  %s594_s2 = inlined_call_operand.vmem [shape: f32[2,10,1], index: 2, kind: output, shape index: {}]  }
   0x1   :  { %s526_s11 = smov 0  }
   0x2 LB: > { %s24_s12 = sadd.s32 1, %s500_s10  ;;  %p417_p0 = scmp.ge.s32.totalorder %s504_s11, 1  ;;  %s504_s11 = sphi %s526_s11, %s12_s11   ;;  %s500_s10 = sphi %s524_s10, %s596_s10   ;;  %s496_s9 = sphi %s522_s9, %s595_s9  }
   0x3   : > { %p26_p1 = scmp.ge.s32.totalorder %s24_s12, 2  ;;  %p129_p2 = scmp.lt.s32.totalorder %s504_s11, 3 }
   0x5   : > { %s598_s12 = smov (%p26_p1, %s24_s12), 0  ;;  %p130_p3 = pnand %p417_p0, %p129_p2 }
   0x6   : > { %p154_p4 = scmp.lt.s32.totalorder (!%p130_p3), %s496_s9, 1 }
   0x7   : > { %133 = sbr.rel (%p130_p3) target bundleno = 381 (0x17d), region = 28 }
   0xc   : > { %vm171_vm0 = vcmask 7168   ;;  %v506_v0 = vmov 0.0   ;;  %s600_s9 = smov (!%p154_p4, %s496_s9), 1  ;;  %vm196_vm1 = vcmask 130048   ;;  %v257_v17 = vld [vmem:[%s593_s1] sm:$0xff]  ;;  %vm259_vm2 = vcmask 523264  }
   0xd   : > { %179 = vst.msk [vmem:[#allocation2 + $0x38] sm:$0xff] %vm171_vm0, %v506_v0  ;;  %172 = vst.msk [vmem:[#allocation2] sm:$0xff] %vm171_vm0, %v506_v0  ;;  %s426_s13 = sshll.u32 %s600_s9, 6  ;;  %454 = vmatprep.mubr.msk.f32.mxu0 %vm259_vm2, %v257_v17  ;;  %v258_v58 = vld [vmem:[%s593_s1 + $0x8] sm:$0x3]  ;;  %s427_s21 = sshll.u32 %s600_s9, 4 }
   0xe   : > { %173 = vst.msk [vmem:[#allocation2 + $0x8] sm:$0xff] %vm171_vm0, %v506_v0  ;;  %174 = vst.msk [vmem:[#allocation2 + $0x10] sm:$0xff] %vm171_vm0, %v506_v0  ;;  %s161_s16 = scalar_lea.vmem %s592_s0, %s426_s13  ;;  %s166_s24 = scalar_lea.vmem %s594_s2, %s427_s21  ;;  %vm342_vm3 = vcmask 1024  }
   0xf   : > { %175 = vst.msk [vmem:[#allocation2 + $0x18] sm:$0xff] %vm171_vm0, %v506_v0  ;;  %176 = vst.msk [vmem:[#allocation2 + $0x20] sm:$0xff] %vm171_vm0, %v506_v0  ;;  %v187_v1 = vld [vmem:[%s161_s16 + $0x38] sm:$0xff]  ;;  %v186_v2 = vld [vmem:[%s161_s16 + $0x30] sm:$0xff] }
  0x10   : > { %177 = vst.msk [vmem:[#allocation2 + $0x28] sm:$0xff] %vm171_vm0, %v506_v0  ;;  %178 = vst.msk [vmem:[#allocation2 + $0x30] sm:$0xff] %vm171_vm0, %v506_v0  ;;  %v185_v3 = vld [vmem:[%s161_s16 + $0x28] sm:$0xff]  ;;  %v218_v4 = vsel %vm196_vm1, %v187_v1, 0.0  ;;  %v184_v6 = vld [vmem:[%s161_s16 + $0x20] sm:$0xff]  ;;  %v215_v7 = vsel %vm196_vm1, %v186_v2, 0.0 }
  0x11   : > { %v212_v5 = vsel %vm196_vm1, %v185_v3, 0.0  ;;  %219 = vadd.xlane.f32.xlu0 %v218_v4  ;;  %v209_v8 = vsel %vm196_vm1, %v184_v6, 0.0  ;;  %v183_v9 = vld [vmem:[%s161_s16 + $0x18] sm:$0xff]  ;;  %v182_v10 = vld [vmem:[%s161_s16 + $0x10] sm:$0xff]  ;;  %v181_v13 = vld [vmem:[%s161_s16 + $0x8] sm:$0xff] }
  0x12   : > { %213 = vadd.xlane.f32.xlu1 %v212_v5  ;;  %v206_v11 = vsel %vm196_vm1, %v183_v9, 0.0  ;;  %v203_v12 = vsel %vm196_vm1, %v182_v10, 0.0  ;;  %v180_v14 = vld [vmem:[%s161_s16] sm:$0xff]  ;;  %v200_v15 = vsel %vm196_vm1, %v181_v13, 0.0 }
  0x13   : > { %v197_v16 = vsel %vm196_vm1, %v180_v14, 0.0 }
  0x14   : > { %v195_v18 = vld [vmem:[#allocation2 + $0x38] sm:$0xff]  ;;  %v188_v38 = vld [vmem:[#allocation2] sm:$0xff] }
  0x15   : > { %216 = vadd.xlane.f32.xlu0 %v215_v7  ;;  %v190_v31 = vld [vmem:[#allocation2 + $0x10] sm:$0xff]  ;;  %v189_v37 = vld [vmem:[#allocation2 + $0x8] sm:$0xff] }
  0x16   : > { %210 = vadd.xlane.f32.xlu1 %v209_v8  ;;  %v192_v25 = vld [vmem:[#allocation2 + $0x20] sm:$0xff]  ;;  %v191_v30 = vld [vmem:[#allocation2 + $0x18] sm:$0xff] }
  0x17   : > { %v193_v19 = vld [vmem:[#allocation2 + $0x28] sm:$0xff]  ;;  %v194_v24 = vld [vmem:[#allocation2 + $0x30] sm:$0xff] }
  0x19   : > { %207 = vadd.xlane.f32.xlu0 %v206_v11 }
  0x1a   : > { %204 = vadd.xlane.f32.xlu1 %v203_v12 }
  0x1d   : > { %201 = vadd.xlane.f32.xlu0 %v200_v15 }
  0x1e   : > { %198 = vadd.xlane.f32.xlu1 %v197_v16 }
  0x9a   : > { %v220_v20 = vpop.xlane.xlu0 %219 }
  0x9b   : > { %v214_v21 = vpop.xlane.xlu1 %213  ;;  %v228_v22 = vadd.f32 %v220_v20, %v195_v18 }
  0x9c   : > { %v226_v23 = vadd.f32 %v214_v21, %v193_v19 }
  0x9d   : > { %237 = vst.msk [vmem:[#allocation2 + $0x38] sm:$0xff] %vm171_vm0, %v228_v22 }
  0x9e   : > { %235 = vst.msk [vmem:[#allocation2 + $0x28] sm:$0xff] %vm171_vm0, %v226_v23  ;;  %v217_v26 = vpop.xlane.xlu0 %216 }
  0x9f   : > { %v211_v27 = vpop.xlane.xlu1 %210  ;;  %v227_v28 = vadd.f32 %v217_v26, %v194_v24 }
  0xa0   : > { %v225_v29 = vadd.f32 %v211_v27, %v192_v25 }
  0xa1   : > { %236 = vst.msk [vmem:[#allocation2 + $0x30] sm:$0xff] %vm171_vm0, %v227_v28 }
  0xa2   : > { %234 = vst.msk [vmem:[#allocation2 + $0x20] sm:$0xff] %vm171_vm0, %v225_v29  ;;  %v208_v32 = vpop.xlane.xlu0 %207 }
  0xa3   : > { %v205_v33 = vpop.xlane.xlu1 %204  ;;  %v224_v34 = vadd.f32 %v208_v32, %v191_v30 }
  0xa4   : > { %v223_v35 = vadd.f32 %v205_v33, %v190_v31  ;;  %v248_v36 = vld [vmem:[#allocation2 + $0x38] sm:$0xff] }
  0xa5   : > { %233 = vst.msk [vmem:[#allocation2 + $0x18] sm:$0xff] %vm171_vm0, %v224_v34  ;;  %v256_v39 = vmul.f32 0.0625, %v248_v36  ;;  %v246_v45 = vld [vmem:[#allocation2 + $0x28] sm:$0xff] }
  0xa6   : > { %232 = vst.msk [vmem:[#allocation2 + $0x10] sm:$0xff] %vm171_vm0, %v223_v35  ;;  %v202_v40 = vpop.xlane.xlu0 %201  ;;  %v254_v48 = vmul.f32 0.0625, %v246_v45 }
  0xa7   : > { %v199_v41 = vpop.xlane.xlu1 %198  ;;  %438 = vmatprep.subr.mxu0 %v256_v39  ;;  %v222_v42 = vadd.f32 %v202_v40, %v189_v37 }
  0xa8   : > { %v221_v43 = vadd.f32 %v199_v41, %v188_v38  ;;  %439 = vmatpush3.msra.mxu0 %v256_v39  ;;  %v247_v44 = vld [vmem:[#allocation2 + $0x30] sm:$0xff] }
  0xa9   : > { %v245_v46 = vld [vmem:[#allocation2 + $0x20] sm:$0xff]  ;;  %231 = vst.msk [vmem:[#allocation2 + $0x8] sm:$0xff] %vm171_vm0, %v222_v42  ;;  %v255_v47 = vmul.f32 0.0625, %v247_v44 }
  0xaa   : > { %230 = vst.msk [vmem:[#allocation2] sm:$0xff] %vm171_vm0, %v221_v43  ;;  %v253_v49 = vmul.f32 0.0625, %v245_v46 }
  0xab   : > { %440 = vmatprep.subr.mxu0 %v255_v47 }
  0xac   : > { %441 = vmatpush3.msra.mxu0 %v255_v47  ;;  %v244_v50 = vld [vmem:[#allocation2 + $0x18] sm:$0xff] }
  0xad   : > { %v243_v51 = vld [vmem:[#allocation2 + $0x10] sm:$0xff]  ;;  %442 = vmatprep.subr.mxu0 %v254_v48  ;;  %v252_v52 = vmul.f32 0.0625, %v244_v50 }
  0xae   : > { %443 = vmatpush3.msra.mxu0 %v254_v48  ;;  %v251_v53 = vmul.f32 0.0625, %v243_v51 }
  0xaf   : > { %444 = vmatprep.subr.mxu0 %v253_v49 }
  0xb0   : > { %445 = vmatpush3.msra.mxu0 %v253_v49  ;;  %v242_v54 = vld [vmem:[#allocation2 + $0x8] sm:$0xff] }
  0xb1   : > { %v241_v55 = vld [vmem:[#allocation2] sm:$0xff]  ;;  %446 = vmatprep.subr.mxu0 %v252_v52  ;;  %v250_v56 = vmul.f32 0.0625, %v242_v54 }
  0xb2   : > { %447 = vmatpush3.msra.mxu0 %v252_v52  ;;  %v249_v57 = vmul.f32 0.0625, %v241_v55 }
  0xb3   : > { %448 = vmatprep.subr.mxu0 %v251_v53 }
  0xb4   : > { %449 = vmatpush3.msra.mxu0 %v251_v53 }
  0xb5   : > { %450 = vmatprep.subr.mxu0 %v250_v56 }
  0xb6   : > { %451 = vmatpush3.msra.mxu0 %v250_v56 }
  0xb7   : > { %452 = vmatprep.subr.mxu0 %v249_v57 }
  0xb8   : > { %453 = vmatpush3.msra.mxu0 %v249_v57 }
  0xb9   : > { %455 = vmatmul.mubr.msk.f32.vlgmr.msra.gmra.mxu0 %vm259_vm2, %v258_v58 }
 0x179   : > { %v456_v59 = vpop.f32.mrf.mxu0 }
 0x17a   : > { %343 = vst.msk [vmem:[%s166_s24 + $0x8] sm:$0x3] %vm342_vm3, %v456_v59 }
 0x17b   : > { %v332_v60 = vpop.f32.mrf.mxu0 }
 0x17c   : > { %341 = vst.msk [vmem:[%s166_s24] sm:$0xff] %vm171_vm0, %v332_v60 }
 0x17d PF: > { %s12_s11 = sadd.s32 1, %s504_s11   ;;  %s595_s9 = smov %s500_s10 }
 0x17e   : > { %p9_p5 = scmp.ge.s32.totalorder %s12_s11, 4   ;;  %s596_s10 = smov %s598_s12 }
 0x180   :  { %11 = sbr.rel (!%p9_p5) target bundleno = 2 (0x2), region = 66 }

</bundles_post_ra>
